<compile_context>
chip_gen: v6e
topology: v6e:2x2x1
jax: 0.10.0
libtpu: 0.0.40
codegen_flags: <defaults>
</compile_context>

<pallas_src>
import functools
from types import SimpleNamespace

import jax
import jax.numpy as jnp
from jax.experimental import pallas as pl
from jax.experimental.pallas import tpu as pltpu


def _round_up(x, m):
    return (x + m - 1) // m * m


# ----------------------------------------------------------------------------
# Pallas kernel: fused Linear1 -> activation -> Linear2(out=1) -> (+ trend+b2)
# The collapsed (batch*pred_len) row axis lives in the LANE dim of the output.
# ----------------------------------------------------------------------------
def _head_kernel(x_ref, w1_ref, b1_ref, w2_ref, t_ref, o_ref, *,
                 activation, gelu_approximate):
    # x_ref : (TILE_M, d_model)  dec_season tail rows, natural layout
    # w1_ref: (d_ff, d_model)    nn.Linear1 weight, PyTorch (out, in) layout
    # b1_ref: (d_ff, 1)          nn.Linear1 bias as a column
    # w2_ref: (d_ff, 1)          nn.Linear2 weight as a column
    # t_ref : (1, TILE_M)        dec_trend + b2 (pre-folded), lane-dense
    # o_ref : (1, TILE_M)        predict_value rows, lane-dense
    #
    # Contract over d_model (axis 1 of both operands) -> (d_ff, TILE_M); the
    # row axis lands in the lane dim so no host transpose is needed and the
    # 1-channel result stays lane-dense.
    h = jax.lax.dot_general(
        w1_ref[...], x_ref[...],
        dimension_numbers=(((1,), (1,)), ((), ())),
        preferred_element_type=jnp.float32)                      # MXU
    h = h + b1_ref[...]                                          # broadcast over lanes
    if activation == "relu":
        h = jnp.maximum(h, 0.0)
    elif gelu_approximate:
        h = jax.nn.gelu(h, approximate=True)   # tanh form -> EUP slot (fast path)
    else:
        h = jax.nn.gelu(h, approximate=False)  # exact erf, matches PyTorch F.gelu
    # Linear2 has out_features == 1: an N=1 MXU pass would waste the systolic
    # array, so use a VPU multiply + sublane (XLU) reduce instead.
    y = jnp.sum(h * w2_ref[...], axis=0, keepdims=True)          # (1, TILE_M)
    o_ref[...] = (y + t_ref[...]).astype(o_ref.dtype)


def prediction_head(dec_season, dec_trend, w1, b1, w2, b2, *, pred_len,
                    activation="relu", matmul_dtype=jnp.bfloat16,
                    gelu_approximate=False, tile_m_cap=512):
    """predict_value = dec_trend + Linear2(act(Linear1(dec_season)))[:, -pred_len:, :].

    dec_season: (B, L_dec, d_model) f32
    dec_trend : (B, pred_len, 1)    f32
    w1: (d_ff, d_model)  b1: (d_ff,)     -- PyTorch nn.Linear layouts
    w2: (1, d_ff)        b2: (1,)
    matmul_dtype: operands of the first matmul (default bf16 on all gens —
                  the MXU is natively bf16; accumulation / elementwise stay f32).
    """
    B, L_dec, Dm = dec_season.shape
    Dff = w1.shape[0]
    P = int(pred_len)
    M = B * P
    dsize = jnp.dtype(matmul_dtype).itemsize

    # ---- VMEM budget (v7x: 64 MiB physical, 32 MiB default scoped limit) ---
    def vmem_need(tm):
        return (2 * tm * Dm * dsize          # double-buffered x tile
                + 2 * Dff * Dm * dsize       # W1 buffers (resident, conservative x2)
                + Dff * tm * 4               # f32 activation intermediate
                + 4 * Dff * 4                # b1 / w2 columns
                + 4 * tm * 4 * 2)            # trend + output rows

    try:
        vmem_cap = int(pltpu.get_tpu_info().vmem_capacity_bytes)
    except Exception:  # trace-time query unavailable -> assume smallest (v7x)
        vmem_cap = 64 << 20
    budget = int(0.7 * vmem_cap)

    cap = max(128, _round_up(int(tile_m_cap), 128))
    while cap > 128 and vmem_need(cap) > budget:
        cap -= 128

    # ---- tile choice: lane-dense, minimal padding waste, >=2 tiles so the
    #      "parallel" grid axis actually uses both v7x TensorCores. ----------
    m_128 = _round_up(M, 128)
    n_min = 2 if m_128 >= 256 else 1
    best = None
    tm = 128
    while tm <= cap:
        nt = max(n_min, pl.cdiv(m_128, tm))
        mp = nt * tm
        if best is None or mp < best[0] or (mp == best[0] and tm > best[1]):
            best = (mp, tm, nt)
        tm += 128
    m_pad, tile_m, n_tiles = best

    # x stays in natural (rows, d_model) layout — no wrapper transpose; the
    # slice / reshape / pad fuse into a single copy of the tail.
    # TODO(synk): reading dec_season in place via an element-offset index_map
    # would avoid even that copy, but only when label_len aligns to the tile.
    x_tail = dec_season[:, -P:, :].reshape(M, Dm)
    x_tail = jnp.pad(x_tail, ((0, m_pad - M), (0, 0))).astype(matmul_dtype)

    # Fold Linear2 bias into the trend stream; lane-dense (1, m_pad).
    t_row = dec_trend.reshape(M) + b2.reshape(()).astype(jnp.float32)
    t_row = jnp.pad(t_row, (0, m_pad - M)).reshape(1, m_pad)

    b1_col = b1.reshape(Dff, 1).astype(jnp.float32)
    w2_col = w2.reshape(Dff, 1).astype(jnp.float32)

    cost = pl.CostEstimate(
        flops=2 * m_pad * Dff * Dm + 2 * m_pad * Dff,
        transcendentals=(m_pad * Dff) if activation != "relu" else 0,
        bytes_accessed=(m_pad * Dm * dsize + Dff * Dm * dsize
                        + 2 * Dff * 4 + 2 * m_pad * 4),
    )

    kernel = functools.partial(_head_kernel, activation=activation,
                               gelu_approximate=gelu_approximate)
    out = pl.pallas_call(
        kernel,
        out_shape=jax.ShapeDtypeStruct((1, m_pad), jnp.float32),
        grid_spec=pltpu.PrefetchScalarGridSpec(
            num_scalar_prefetch=0,
            grid=(n_tiles,),
            in_specs=[
                pl.BlockSpec((tile_m, Dm), lambda i: (i, 0)),   # x row-tile (natural)
                pl.BlockSpec((Dff, Dm), lambda i: (0, 0)),      # W1 (resident)
                pl.BlockSpec((Dff, 1), lambda i: (0, 0)),       # b1 (resident)
                pl.BlockSpec((Dff, 1), lambda i: (0, 0)),       # w2 (resident)
                pl.BlockSpec((1, tile_m), lambda i: (0, i)),    # trend + b2
            ],
            out_specs=pl.BlockSpec((1, tile_m), lambda i: (0, i)),
        ),
        compiler_params=pltpu.CompilerParams(
            dimension_semantics=("parallel",),   # tiles split across TCs on v7x
            vmem_limit_bytes=int(min(vmem_cap,
                                     max(32 << 20, 2 * vmem_need(tile_m)))),
        ),
        cost_estimate=cost,
    )(x_tail, w1.astype(matmul_dtype), b1_col, w2_col, t_row)

    # Padded tail columns compute garbage but are sliced off here (keep in sync
    # with the tiling scheme above).
    return out[0, :M].reshape(B, P, 1)


# ----------------------------------------------------------------------------
# Full Myformer forward (glue in plain JAX, defined hot path in Pallas)
# ----------------------------------------------------------------------------
def init_params(key, args):
    ks = jax.random.split(key, 8)
    s = 0.05
    return {
        # stand-in embedding weights (sub-module sources not provided)
        "emb_enc_W": s * jax.random.normal(ks[0], (args.enc_in, args.d_model), jnp.float32),
        "emb_dec_W": s * jax.random.normal(ks[1], (args.dec_in, args.d_model), jnp.float32),
        "emb_time_W": s * jax.random.normal(ks[2], (args.time_feats, args.d_model), jnp.float32),
        # prediction head, stored in PyTorch nn.Linear layout (out, in) / (out,)
        "lin1_W": s * jax.random.normal(ks[3], (args.d_ff, args.d_model), jnp.float32),
        "lin1_b": s * jax.random.normal(ks[4], (args.d_ff,), jnp.float32),
        "lin2_W": s * jax.random.normal(ks[5], (1, args.d_ff), jnp.float32),
        "lin2_b": s * jax.random.normal(ks[6], (1,), jnp.float32),
    }


def myformer_forward(params, batch_en_x, batch_den_x, batch_en_time, batch_den_time,
                     args, *, matmul_dtype=jnp.bfloat16):
    B = batch_en_x.shape[0]

    # TODO(synk): Creat_inps source not provided; stand-in builds seasonal_init /
    # trend_init as [label part of decoder input | zeros / encoder mean].
    seasonal_init = jnp.concatenate(
        [batch_den_x[:, : args.label_len, :],
         jnp.zeros((B, args.pred_len, args.dec_in), jnp.float32)], axis=1)
    trend_init = jnp.concatenate(
        [batch_den_x[:, : args.label_len, :],
         jnp.tile(jnp.mean(batch_en_x, axis=1, keepdims=True), (1, args.pred_len, 1))],
        axis=1)

    # TODO(synk): BeginEmbded source not provided; stand-in = value + time linear embedding.
    batch_enc_x = jnp.tanh(batch_en_x @ params["emb_enc_W"]
                           + batch_en_time @ params["emb_time_W"])
    batch_denc_season = jnp.tanh(seasonal_init @ params["emb_dec_W"]
                                 + batch_den_time @ params["emb_time_W"])
    batch_denc_trend = trend_init @ params["emb_dec_W"]

    # TODO(synk): EncoderStack source not provided; stand-in = identity.
    enc_out = batch_enc_x

    # matches the given forward: when useTrend_init is False the trend init is zeroed
    if not args.useTrend_init:
        batch_denc_trend = jnp.zeros_like(batch_denc_trend)

    # TODO(synk): DecoderStack source not provided; stand-in passes the seasonal
    # stream through and reduces the trend stream to 1 channel over the horizon.
    dec_season = batch_denc_season + 0.0 * jnp.mean(enc_out, axis=1, keepdims=True)
    dec_trend = jnp.mean(batch_denc_trend[:, -args.pred_len:, :], axis=-1, keepdims=True)

    # Defined hot path (Pallas): Linear1 -> act -> Linear2 -> tail slice -> + trend.
    # nn.Linear is position-wise, so computing only the last pred_len rows is exact.
    predict_value = prediction_head(
        dec_season, dec_trend,
        params["lin1_W"], params["lin1_b"], params["lin2_W"], params["lin2_b"],
        pred_len=args.pred_len, activation=args.activation,
        matmul_dtype=matmul_dtype)

    # TODO(synk): args.weatherSTList host-side list appends (.cpu().numpy()) are
    # not representable in a TPU kernel; omitted (weatherSTList=False here).
    return predict_value


# ----------------------------------------------------------------------------
# pure-JAX reference for the Pallas head (correctness check)
# ----------------------------------------------------------------------------
def _head_ref(x_tail, t, w1, b1, w2, b2, activation):
    h = x_tail @ w1.T + b1
    h = jnp.maximum(h, 0.0) if activation == "relu" else jax.nn.gelu(h, approximate=False)
    return (h @ w2.T + b2) + t


if __name__ == "__main__":
    args = SimpleNamespace(
        d_model=32, d_ff=64, activation="relu",
        seq_len=16, label_len=8, pred_len=8,
        enc_in=4, dec_in=4, time_feats=4,
        useTrend_init=False, weatherSTList=False,
    )

    key = jax.random.PRNGKey(0)
    k_in, k_par = jax.random.split(key)
    k1, k2, k3, k4 = jax.random.split(k_in, 4)

    B = 2
    L_dec = args.label_len + args.pred_len
    batch_en_x = jax.random.normal(k1, (B, args.seq_len, args.enc_in), jnp.float32)
    batch_den_x = jax.random.normal(k2, (B, L_dec, args.dec_in), jnp.float32)
    batch_en_time = jax.random.normal(k3, (B, args.seq_len, args.time_feats), jnp.float32)
    batch_den_time = jax.random.normal(k4, (B, L_dec, args.time_feats), jnp.float32)

    params = init_params(k_par, args)

    # pure-JAX reference of the Pallas head against the same glue stand-ins
    seasonal_init = jnp.concatenate(
        [batch_den_x[:, : args.label_len, :],
         jnp.zeros((B, args.pred_len, args.dec_in), jnp.float32)], axis=1)
    dec_season = jnp.tanh(seasonal_init @ params["emb_dec_W"]
                          + batch_den_time @ params["emb_time_W"])
    dec_trend = jnp.zeros((B, args.pred_len, 1), jnp.float32)
    ref = _head_ref(dec_season[:, -args.pred_len:, :], dec_trend,
                    params["lin1_W"], params["lin1_b"],
                    params["lin2_W"], params["lin2_b"], args.activation)

    # default path: bf16 operands / f32 accumulation (all generations)
    out = myformer_forward(params, batch_en_x, batch_den_x,
                           batch_en_time, batch_den_time, args)
    out = jax.block_until_ready(out)
    assert out.shape == (B, args.pred_len, 1), out.shape
    assert jnp.allclose(out, ref, atol=5e-2, rtol=5e-2), (
        float(jnp.max(jnp.abs(out - ref))))

    # exact f32-operand path (matches PyTorch numerics tightly)
    out_f32 = myformer_forward(params, batch_en_x, batch_den_x,
                               batch_en_time, batch_den_time, args,
                               matmul_dtype=jnp.float32)
    out_f32 = jax.block_until_ready(out_f32)
    assert out_f32.shape == (B, args.pred_len, 1), out_f32.shape
    assert jnp.allclose(out_f32, ref, atol=1e-4, rtol=1e-4), (
        float(jnp.max(jnp.abs(out_f32 - ref))))

    print("KERNEL_OK")
</pallas_src>

<mosaic_0001>
module attributes {stable_mosaic.version = 11 : i64} {
  func.func @_head_kernel(%arg0: i32, %arg1: memref<128x32xbf16, #tpu.memory_space<vmem>>, %arg2: memref<64x32xbf16, #tpu.memory_space<vmem>>, %arg3: memref<64x1xf32, #tpu.memory_space<vmem>>, %arg4: memref<64x1xf32, #tpu.memory_space<vmem>>, %arg5: memref<1x128xf32, #tpu.memory_space<vmem>>, %arg6: memref<1x128xf32, #tpu.memory_space<vmem>>) attributes {dimension_semantics = [#tpu.dimension_semantics<parallel>], iteration_bounds = array<i64: 1>, scalar_prefetch = 0 : i64, scratch_operands = 0 : i64, tpu.core_type = #tpu.core_type<tc>, window_params = [{transform_indices = @transform_0, window_bounds = array<i64: 128, 32>}, {pipeline_mode = #tpu.pipeline_mode<synchronous>, transform_indices = @transform_1, window_bounds = array<i64: 64, 32>}, {pipeline_mode = #tpu.pipeline_mode<synchronous>, transform_indices = @transform_2, window_bounds = array<i64: 64, 1>}, {pipeline_mode = #tpu.pipeline_mode<synchronous>, transform_indices = @transform_3, window_bounds = array<i64: 64, 1>}, {transform_indices = @transform_4, window_bounds = array<i64: 1, 128>}, {transform_indices = @transform_5, window_bounds = array<i64: 1, 128>}]} {
    %c0 = arith.constant 0 : index
    %c0_0 = arith.constant 0 : index
    %0 = vector.load %arg2[%c0, %c0_0] : memref<64x32xbf16, #tpu.memory_space<vmem>>, vector<64x32xbf16>
    %c0_1 = arith.constant 0 : index
    %c0_2 = arith.constant 0 : index
    %1 = vector.load %arg1[%c0_1, %c0_2] : memref<128x32xbf16, #tpu.memory_space<vmem>>, vector<128x32xbf16>
    %cst = arith.constant dense<0.000000e+00> : vector<64x128xf32>
    %2 = tpu.matmul %0, %1, %cst {dimension_numbers = #tpu.dot_dimension_numbers<[1], [1], [0], [0], [0, 0, 1, 0], [], []>} : vector<64x32xbf16>, vector<128x32xbf16>, vector<64x128xf32> -> vector<64x128xf32>
    %c0_3 = arith.constant 0 : index
    %c0_4 = arith.constant 0 : index
    %3 = vector.load %arg3[%c0_3, %c0_4] : memref<64x1xf32, #tpu.memory_space<vmem>>, vector<64x1xf32>
    %4 = vector.broadcast %3 : vector<64x1xf32> to vector<64x128xf32>
    %5 = arith.addf %2, %4 : vector<64x128xf32>
    %cst_5 = arith.constant 0.000000e+00 : f32
    %6 = vector.broadcast %cst_5 : f32 to vector<64x128xf32>
    %7 = arith.maximumf %5, %6 : vector<64x128xf32>
    %c0_6 = arith.constant 0 : index
    %c0_7 = arith.constant 0 : index
    %8 = vector.load %arg4[%c0_6, %c0_7] : memref<64x1xf32, #tpu.memory_space<vmem>>, vector<64x1xf32>
    %9 = vector.broadcast %8 : vector<64x1xf32> to vector<64x128xf32>
    %10 = arith.mulf %7, %9 : vector<64x128xf32>
    %cst_8 = arith.constant dense<0.000000e+00> : vector<128xf32>
    %11 = vector.multi_reduction <add>, %10, %cst_8 [0] : vector<64x128xf32> to vector<128xf32>
    %12 = vector.shape_cast %11 : vector<128xf32> to vector<1x128xf32>
    %c0_9 = arith.constant 0 : index
    %c0_10 = arith.constant 0 : index
    %13 = vector.load %arg5[%c0_9, %c0_10] : memref<1x128xf32, #tpu.memory_space<vmem>>, vector<1x128xf32>
    %14 = arith.addf %12, %13 : vector<1x128xf32>
    %c0_11 = arith.constant 0 : index
    %c0_12 = arith.constant 0 : index
    %15 = vector.load %arg6[%c0_11, %c0_12] : memref<1x128xf32, #tpu.memory_space<vmem>>, vector<1x128xf32>
    tpu.vector_store %arg6[%c0_11, %c0_12], %14 {strides = array<i32>} : memref<1x128xf32, #tpu.memory_space<vmem>>, vector<1x128xf32>,
    return
  }
  func.func @transform_0(%arg0: i32) -> (i32, i32) {
    %c0_i32 = arith.constant 0 : i32
    %c0_i32_0 = arith.constant 0 : i32
    return %arg0, %c0_i32 : i32, i32
  }
  func.func @transform_1(%arg0: i32) -> (i32, i32) {
    %c0_i32 = arith.constant 0 : i32
    %c0_i32_0 = arith.constant 0 : i32
    %c0_i32_1 = arith.constant 0 : i32
    return %c0_i32, %c0_i32_0 : i32, i32
  }
  func.func @transform_2(%arg0: i32) -> (i32, i32) {
    %c0_i32 = arith.constant 0 : i32
    %c0_i32_0 = arith.constant 0 : i32
    %c0_i32_1 = arith.constant 0 : i32
    return %c0_i32, %c0_i32_0 : i32, i32
  }
  func.func @transform_3(%arg0: i32) -> (i32, i32) {
    %c0_i32 = arith.constant 0 : i32
    %c0_i32_0 = arith.constant 0 : i32
    %c0_i32_1 = arith.constant 0 : i32
    return %c0_i32, %c0_i32_0 : i32, i32
  }
  func.func @transform_4(%arg0: i32) -> (i32, i32) {
    %c0_i32 = arith.constant 0 : i32
    %c0_i32_0 = arith.constant 0 : i32
    return %c0_i32, %arg0 : i32, i32
  }
  func.func @transform_5(%arg0: i32) -> (i32, i32) {
    %c0_i32 = arith.constant 0 : i32
    %c0_i32_0 = arith.constant 0 : i32
    return %c0_i32, %arg0 : i32, i32
  }
}

</mosaic_0001>

<bundles_post_ra>
// kernel: tpu_custom_call.1
= control target key start
LH: loop header
LB: loop body
LE: loop exit
PB: predicated region body
PF: predicated region fallthrough
CT: control target
= control target key end

     0   :  { %vm154_vm0 = vcmask 261120   ;;  %v472_v3 = vmov 0   ;;  %s622_s0 = inlined_call_operand.vmem [shape: bf16[128,32], index: 0, kind: input, shape index: {}]   ;;  %s623_s1 = inlined_call_operand.vmem [shape: bf16[64,32], index: 1, kind: input, shape index: {}]   ;;  %s624_s2 = inlined_call_operand.vmem [shape: f32[64,1], index: 2, kind: input, shape index: {}]   ;;  %s625_s3 = inlined_call_operand.vmem [shape: f32[64,1], index: 3, kind: input, shape index: {}]   ;;  %s626_s4 = inlined_call_operand.vmem [shape: f32[1,128], index: 4, kind: input, shape index: {}]   ;;  %s627_s5 = inlined_call_operand.hbm [shape: f32[1,128], index: 5, kind: output, shape index: {}]  }
   0x1   :  { %v438_v0 = vld [vmem:[%s622_s0 + $0x38] sm:$0xff]   ;;  %v439_v1 = vld [vmem:[%s622_s0 + $0x30] sm:$0xff]   ;;  %436 = vset.pattern.permute.xlu0 %v472_v3  ;;  %437 = vset.pattern.permute.xlu1 %v472_v3  ;;  %v440_v4 = vld [vmem:[%s622_s0 + $0x28] sm:$0xff]  }
   0x2   :  { %418 = vmatprep.subr.msk.bf16.mxu0 %vm154_vm0, %v438_v0  ;;  %419 = vmatprep.subr.msk.bf16.mxu1 %vm154_vm0, %v438_v0  ;;  %v189_v2 = vsel %vm154_vm0, %v438_v0, 0  ;;  %v186_v5 = vsel %vm154_vm0, %v439_v1, 0  ;;  %v446_v6 = vld [vmem:[%s623_s1] sm:$0xff]   ;;  %v447_v7 = vld [vmem:[%s623_s1 + $0x10] sm:$0xff]   ;;  %v47_v10 = vld [vmem:[%s624_s2 + $0x8] sm:$0xff]  ;;  %v183_v12 = vsel %vm154_vm0, %v440_v4, 0 }
   0x3   :  { %379 = vmatpush3.bf16.xpose.msra.mxu0 %v189_v2  ;;  %410 = vmatpush3.bf16.xpose.msra.mxu1 %v189_v2  ;;  %v46_v8 = vld [vmem:[%s624_s2] sm:$0xff]  ;;  %v48_v9 = vld [vmem:[%s624_s2 + $0x10] sm:$0xff]  ;;  %v49_v11 = vld [vmem:[%s624_s2 + $0x18] sm:$0xff] }
   0x4   :  { %420 = vmatprep.subr.msk.bf16.mxu0 %vm154_vm0, %v439_v1  ;;  %421 = vmatprep.subr.msk.bf16.mxu1 %vm154_vm0, %v439_v1  ;;  %v441_v13 = vld [vmem:[%s622_s0 + $0x20] sm:$0xff]  }
   0x5   :  { %394 = vmatprep.mubr.msk.bf16.mxu0 %vm154_vm0, %v446_v6  ;;  %398 = vmatprep.mubr.msk.bf16.mxu1 %vm154_vm0, %v447_v7 }
   0x6   :  { %56 = vperm.xlu0 %436, %v46_v8   ;;  %66 = vperm.xlu1 %437, %v48_v9  }
   0xa   :  { %61 = vperm.xlu0 %436, %v47_v10  }
   0xb   :  { %381 = vmatpush3.bf16.xpose.msra.mxu0 %v186_v5  ;;  %411 = vmatpush3.bf16.xpose.msra.mxu1 %v186_v5 }
   0xc   :  { %422 = vmatprep.subr.msk.bf16.mxu0 %vm154_vm0, %v440_v4  ;;  %423 = vmatprep.subr.msk.bf16.mxu1 %vm154_vm0, %v440_v4 }
   0xd   :  { %10 = vsyncpa [#allocation3], 0  ;;  %71 = vperm.xlu1 %437, %v49_v11   ;;  %v264_v14 = vld [vmem:[%s625_s3] sm:$0xff]  ;;  %v265_v15 = vld [vmem:[%s625_s3 + $0x8] sm:$0xff]  ;;  %v180_v18 = vsel %vm154_vm0, %v441_v13, 0  ;;  %s473_s22 = smov [#allocation2]  }
   0xe   :  { %274 = vperm.xlu0 %436, %v264_v14   ;;  %v50_v16 = vld [vmem:[%s624_s2 + $0x20] sm:$0xff]  ;;  %v266_v17 = vld [vmem:[%s625_s3 + $0x10] sm:$0xff]  ;;  %v442_v19 = vld [vmem:[%s622_s0 + $0x18] sm:$0xff]   ;;  %s342_s23 = sshll.u32 %s473_s22, 4  ;;  %s343_s23 = int_to_ptr.vmem [resolvable:$true] %s342_s23 }
   0xf   :  { %v51_v20 = vld [vmem:[%s624_s2 + $0x28] sm:$0xff]  ;;  %v267_v21 = vld [vmem:[%s625_s3 + $0x18] sm:$0xff]  ;;  %v52_v22 = vld [vmem:[%s624_s2 + $0x30] sm:$0xff]  ;;  %v177_v24 = vsel %vm154_vm0, %v442_v19, 0  ;;  %s450_s24 = scalar_lea.vmem %s343_s23, 16  ;;  %s454_s25 = scalar_lea.vmem %s343_s23, 32 }
  0x10   :  { %v268_v23 = vld [vmem:[%s625_s3 + $0x20] sm:$0xff]  ;;  %v443_v25 = vld [vmem:[%s622_s0 + $0x10] sm:$0xff]   ;;  %v53_v26 = vld [vmem:[%s624_s2 + $0x38] sm:$0xff]  ;;  %p451_p0 = scmp.ne.s32.totalorder %s343_s23, %s450_s24  ;;  %p455_p1 = scmp.lt.s32.totalorder %s343_s23, %s343_s23 }
  0x11   :  { %279 = vperm.xlu1 %437, %v265_v15   ;;  %v269_v27 = vld [vmem:[%s625_s3 + $0x28] sm:$0xff]  ;;  %v270_v28 = vld [vmem:[%s625_s3 + $0x30] sm:$0xff]  ;;  %v271_v29 = vld [vmem:[%s625_s3 + $0x38] sm:$0xff]  ;;  %v174_v30 = vsel %vm154_vm0, %v443_v25, 0  ;;  %p456_p2 = scmp.lt.s32.totalorder %s454_s25, %s450_s24 }
  0x12   :  { %76 = vperm.xlu0 %436, %v50_v16   ;;  %v444_v31 = vld [vmem:[%s622_s0 + $0x8] sm:$0xff]   ;;  %v445_v33 = vld [vmem:[%s622_s0] sm:$0xff]   ;;  %v449_v36 = vld [vmem:[%s623_s1 + $0x18] sm:$0xff]  }
  0x13   :  { %383 = vmatpush3.bf16.xpose.msra.mxu0 %v183_v12  ;;  %412 = vmatpush3.bf16.xpose.msra.mxu1 %v183_v12  ;;  %v171_v32 = vsel %vm154_vm0, %v444_v31, 0  ;;  %v168_v34 = vsel %vm154_vm0, %v445_v33, 0  ;;  %v448_v35 = vld [vmem:[%s623_s1 + $0x8] sm:$0xff]   ;;  %p457_p3 = por %p456_p2, %p455_p1 }
  0x14   :  { %424 = vmatprep.subr.msk.bf16.mxu0 %vm154_vm0, %v441_v13  ;;  %425 = vmatprep.subr.msk.bf16.mxu1 %vm154_vm0, %v441_v13 }
  0x15   :  { %284 = vperm.xlu1 %437, %v266_v17   ;;  %p458_p4 = pnand %p457_p3, %p451_p0 }
  0x16   :  { %81 = vperm.xlu0 %436, %v51_v20  }
  0x19   :  { %289 = vperm.xlu1 %437, %v267_v21  }
  0x1a   :  { %86 = vperm.xlu0 %436, %v52_v22  }
  0x1b   :  { %385 = vmatpush3.bf16.xpose.msra.mxu0 %v180_v18  ;;  %413 = vmatpush3.bf16.xpose.msra.mxu1 %v180_v18 }
  0x1c   :  { %426 = vmatprep.subr.msk.bf16.mxu0 %vm154_vm0, %v442_v19  ;;  %427 = vmatprep.subr.msk.bf16.mxu1 %vm154_vm0, %v442_v19 }
  0x1d   :  { %294 = vperm.xlu1 %437, %v268_v23  }
  0x1e   :  { %91 = vperm.xlu0 %436, %v53_v26  }
  0x21   :  { %299 = vperm.xlu1 %437, %v269_v27  }
  0x22   :  { %304 = vperm.xlu0 %436, %v270_v28  }
  0x23   :  { %387 = vmatpush3.bf16.xpose.msra.mxu0 %v177_v24  ;;  %414 = vmatpush3.bf16.xpose.msra.mxu1 %v177_v24 }
  0x24   :  { %428 = vmatprep.subr.msk.bf16.mxu0 %vm154_vm0, %v443_v25  ;;  %429 = vmatprep.subr.msk.bf16.mxu1 %vm154_vm0, %v443_v25 }
  0x25   :  { %309 = vperm.xlu1 %437, %v271_v29  }
  0x2b   :  { %389 = vmatpush3.bf16.xpose.msra.mxu0 %v174_v30  ;;  %415 = vmatpush3.bf16.xpose.msra.mxu1 %v174_v30 }
  0x2c   :  { %430 = vmatprep.subr.msk.bf16.mxu0 %vm154_vm0, %v444_v31  ;;  %431 = vmatprep.subr.msk.bf16.mxu1 %vm154_vm0, %v444_v31 }
  0x33   :  { %391 = vmatpush3.bf16.xpose.msra.mxu0 %v171_v32  ;;  %416 = vmatpush3.bf16.xpose.msra.mxu1 %v171_v32 }
  0x34   :  { %432 = vmatprep.subr.msk.bf16.mxu0 %vm154_vm0, %v445_v33  ;;  %433 = vmatprep.subr.msk.bf16.mxu1 %vm154_vm0, %v445_v33  ;;  %v333_v33 = vld [vmem:[%s626_s4] sm:$0x1] }
  0x3b   :  { %393 = vmatpush3.bf16.xpose.msra.mxu0 %v168_v34  ;;  %417 = vmatpush3.bf16.xpose.msra.mxu1 %v168_v34 }
  0x42   :  { %395 = vmatmul.mubr.msk.bf16.vlgmr.msra.gmra.mxu0 %vm154_vm0, %v448_v35  ;;  %399 = vmatmul.mubr.msk.bf16.vlgmr.msra.gmra.mxu1 %vm154_vm0, %v449_v36 }
  0x81   :  { %v57_v37 = vpop.permute.xlu0 %56  ;;  %v67_v38 = vpop.permute.xlu1 %66 }
  0x85   :  { %v62_v39 = vpop.permute.xlu0 %61 }
  0x88   :  { %v72_v40 = vpop.permute.xlu1 %71 }
  0x89   :  { %v275_v41 = vpop.permute.xlu0 %274 }
  0x8c   :  { %v280_v42 = vpop.permute.xlu1 %279 }
  0x8d   :  { %v77_v43 = vpop.permute.xlu0 %76 }
  0x90   :  { %v285_v44 = vpop.permute.xlu1 %284 }
  0x91   :  { %v82_v47 = vpop.permute.xlu0 %81 }
  0x94   :  { %v290_v50 = vpop.permute.xlu1 %289 }
  0x95   :  { %v87_v59 = vpop.permute.xlu0 %86 }
  0x98   :  { %v295_v0 = vpop.permute.xlu1 %294 }
  0x99   :  { %v92_v9 = vpop.permute.xlu0 %91 }
  0x9c   :  { %v300_v14 = vpop.permute.xlu1 %299 }
  0x9d   :  { %v305_v21 = vpop.permute.xlu0 %304 }
  0xa0   :  { %v310_v24 = vpop.permute.xlu1 %309 }
 0x102   :  { %v396_v45 = vpop.f32.mrf.mxu0  ;;  %v400_v46 = vpop.f32.mrf.mxu1 }
 0x103   :  { %v234_v54 = vadd.f32 %v396_v45, %v67_v38  ;;  %v250_v6 = vadd.f32 %v400_v46, %v87_v59 }
 0x104   :  { %v225_v48 = vpop.f32.mrf.mxu0  ;;  %v241_v49 = vpop.f32.mrf.mxu1 }
 0x105   :  { %v226_v51 = vadd.f32 %v225_v48, %v57_v37  ;;  %v258_v61 = vmax.f32 %v234_v54, 0.0  ;;  %v242_v62 = vadd.f32 %v241_v49, %v77_v43  ;;  %v262_v15 = vmax.f32 %v250_v6, 0.0 }
 0x106   :  { %v397_v52 = vpop.f32.mrf.mxu0  ;;  %v401_v53 = vpop.f32.mrf.mxu1 }
 0x107   :  { %v256_v56 = vmax.f32 %v226_v51, 0.0  ;;  %v237_v57 = vadd.f32 %v397_v52, %v72_v40  ;;  %v314_v5 = vmul.f32 %v285_v44, %v258_v61  ;;  %v260_v7 = vmax.f32 %v242_v62, 0.0 }
 0x108   :  { %v228_v55 = vpop.f32.mrf.mxu0  ;;  %v244_v60 = vpop.f32.mrf.mxu1  ;;  %v253_v11 = vadd.f32 %v401_v53, %v92_v9  ;;  %v318_v22 = vmul.f32 %v305_v21, %v262_v15 }
 0x109   :  { %v229_v58 = vadd.f32 %v228_v55, %v62_v39  ;;  %v312_v1 = vmul.f32 %v275_v41, %v256_v56  ;;  %v259_v2 = vmax.f32 %v237_v57, 0.0  ;;  %v245_v4 = vadd.f32 %v244_v60, %v82_v47 }
 0x10a   :  { %v316_v16 = vmul.f32 %v295_v0, %v260_v7  ;;  %v263_v18 = vmax.f32 %v253_v11, 0.0 }
 0x10b   :  { %v257_v63 = vmax.f32 %v229_v58, 0.0  ;;  %v315_v10 = vmul.f32 %v290_v50, %v259_v2  ;;  %v261_v13 = vmax.f32 %v245_v4, 0.0 }
 0x10c   :  { %v319_v25 = vmul.f32 %v310_v24, %v263_v18 }
 0x10d   :  { %v313_v3 = vmul.f32 %v280_v42, %v257_v63  ;;  %v317_v19 = vmul.f32 %v300_v14, %v261_v13 }
 0x10f   :  { %v320_v8 = vadd.f32 %v313_v3, %v312_v1 }
 0x111   :  { %v321_v12 = vadd.f32 %v320_v8, %v314_v5 }
 0x113   :  { %v322_v17 = vadd.f32 %v321_v12, %v315_v10 }
 0x115   :  { %v323_v20 = vadd.f32 %v322_v17, %v316_v16 }
 0x117   :  { %v324_v23 = vadd.f32 %v323_v20, %v317_v19 }
 0x119   :  { %v325_v26 = vadd.f32 %v324_v23, %v318_v22 }
 0x11b   :  { %v326_v27 = vadd.f32 %v325_v26, %v319_v25 }
 0x11d   :  { %v327_v28 = vrot.slane %v326_v27, 4 }
 0x11f   :  { %v328_v29 = vadd.f32 %v327_v28, %v326_v27 }
 0x121   :  { %v329_v30 = vrot.slane %v328_v29, 2 }
 0x123   :  { %v330_v31 = vadd.f32 %v329_v30, %v328_v29 }
 0x125   :  { %v331_v32 = vrot.slane %v330_v31, 1 }
 0x127   :  { %v332_v34 = vadd.f32 %v331_v32, %v330_v31 }
 0x129   :  { %v334_v35 = vadd.f32 %v333_v33, %v332_v34 }
 0x12b   :  { %335 = vst [vmem:[#allocation2] sm:$0x1] %v334_v35 }
 0x12c   :  { %461 = shalt.err (!%p458_p4)
}
 0x12d   :  { %345 = dma.vmem_to_hbm [thread:$0]  %s343_s23, 16, %s627_s5, [#allocation3]  }
 0x12e   :  { %470 = dma.done.wait [#allocation3], 16  }
 0x12f   :  { %471 = vsyncadd [#allocation3], 4294967280 }
 0x130   :  { %349 = vsyncpa [#allocation3], 1 }

</bundles_post_ra>
